<compile_context>
chip_gen: v7x
topology: tpu7x:2x2x1
jax: 0.10.0
libtpu: 0.0.40
codegen_flags: <defaults>
</compile_context>

<pallas_src>
import math

import jax
import jax.numpy as jnp
from jax import lax
from jax.experimental import pallas as pl
from jax.experimental.pallas import tpu as pltpu


def _gelu(v):
    # tanh-approx GELU: tanh lowers to the (otherwise idle) EUP slot instead of a long
    # erf VALU polynomial.  Max abs deviation from torch's exact erf GELU is ~2e-3,
    # far below the bf16 MXU rounding already present.
    c = math.sqrt(2.0 / math.pi)
    return 0.5 * v * (1.0 + jnp.tanh(c * (v + 0.044715 * v * v * v)))


def gcn_kernel(a_ref, xt_ref, wdr_ref, w0_ref, w1p_ref, bias_ref, out_ref):
    """One group of G graphs per grid step, computed feature-major (transposed space).

    a_ref   : (G*N, G*N) block-diagonal adjacency (bf16)
    xt_ref  : (D, G*N)   x^T slab, column block i = graph i (bf16)
    wdr_ref : (2D, D)    [Wd; Wr] stacked PyTorch-layout weights (bf16), applied as W @ x^T
    w0_ref  : (D, D)     MLP hidden weight (bf16)
    w1p_ref : (D, 1)     gamma * w1  (LayerNorm affine folded into the projection, f32)
    bias_ref: (1, 1)     sum(beta * w1) (f32)
    out_ref : (1, G*N)   lane-dense per-node scores (f32)
    """
    A = a_ref[...]                 # (GN, GN) bf16
    wdr = wdr_ref[...]             # (2D, D)  bf16
    D = w0_ref.shape[0]

    def gcn_layer(xt_bf16):
        # one stacked matmul: rows [:D] = Wd @ x^T (diffusion), rows [D:] = Wr @ x^T (retained)
        dr = jnp.dot(wdr, xt_bf16, preferred_element_type=jnp.float32)     # (2D, GN) f32
        h = _gelu(dr[:D, :])
        ret = dr[D:, :]
        # (A^T @ h)^T = h^T @ A ; block-diagonal A keeps graphs independent
        diff = jnp.dot(h.astype(jnp.bfloat16), A, preferred_element_type=jnp.float32)
        return _gelu(ret + diff)                                            # (D, GN) f32

    h = gcn_layer(xt_ref[...])                                              # layer 1
    h = gcn_layer(h.astype(jnp.bfloat16))                                   # layer 2

    # MLP head: Linear(D->D, no bias) -> gelu -> LayerNorm(D) -> Linear(D->1, no bias)
    # TODO(synk): nn.Dropout(p=0.5) is treated as identity (eval-mode semantics).
    y = _gelu(jnp.dot(w0_ref[...], h.astype(jnp.bfloat16),
                      preferred_element_type=jnp.float32))                  # (D, GN) f32

    # fused LayerNorm statistics over the feature (sublane) axis; clamp against cancellation
    mean = jnp.mean(y, axis=0, keepdims=True)                               # (1, GN)
    mean_sq = jnp.mean(y * y, axis=0, keepdims=True)                        # (1, GN)
    var = jnp.maximum(mean_sq - mean * mean, 0.0)
    y_hat = (y - mean) * lax.rsqrt(var + 1e-5)

    # final projection with LN affine folded in: VPU multiply + sublane reduce, lane-dense store
    out_ref[...] = jnp.sum(y_hat * w1p_ref[...], axis=0, keepdims=True) + bias_ref[...]


def gcn_forward(A, x, params, *, lane_target=128):
    """A: (N, N) or (B, N, N); x: (N, D) or (B, N, D). Returns (N,) or (B, N)."""
    single = A.ndim == 2
    if single:
        A = A[None]
        x = x[None]
    B, N, _ = A.shape
    D = x.shape[-1]

    # graphs per grid step: widen the lane axis to >=128 where possible
    G = max(1, lane_target // N) if N < lane_target else 1
    Bp = -(-B // G) * G                                   # pad batch to a multiple of G
    if Bp != B:
        A = jnp.concatenate([A, jnp.zeros((Bp - B, N, N), A.dtype)], axis=0)
        x = jnp.concatenate([x, jnp.zeros((Bp - B, N, D), x.dtype)], axis=0)
    ngroups = Bp // G
    GN = G * N

    # -------- host-side layout prep (one-time XLA ops) --------
    # TODO(synk): on v5e, cast/cache A in bf16 at graph-construction time instead of per call
    # to avoid the extra f32->bf16 HBM round trip.
    a_grp = A.reshape(ngroups, G, N, N).astype(jnp.bfloat16)
    eye = jnp.eye(G, dtype=jnp.bfloat16)
    a_bd = jnp.einsum("ij,gjab->giajb", eye, a_grp).reshape(ngroups, GN, GN)   # block-diag

    # feature-major slab: columns [i*N:(i+1)*N] are graph i's x^T
    xt = jnp.swapaxes(x, -1, -2).astype(jnp.bfloat16)                       # (Bp, D, N)
    xt = xt.reshape(ngroups, G, D, N).transpose(0, 2, 1, 3).reshape(ngroups, D, GN)

    # stacked weights + LayerNorm-affine folded into the final projection
    wdr = jnp.concatenate([params["wd"], params["wr"]], axis=0).astype(jnp.bfloat16)  # (2D, D)
    w0 = params["w0"].astype(jnp.bfloat16)                                  # (D, D)
    w1 = params["w1"].reshape(D).astype(jnp.float32)
    gamma = params["ln_gamma"].astype(jnp.float32)
    beta = params["ln_beta"].astype(jnp.float32)
    w1p = (gamma * w1).reshape(D, 1)                                        # (D, 1)
    bias = jnp.sum(beta * w1).reshape(1, 1)                                 # (1, 1)

    const = lambda i: (0, 0)   # weight blocks: constant index -> stay VMEM-resident

    out = pl.pallas_call(
        gcn_kernel,
        out_shape=jax.ShapeDtypeStruct((ngroups, 1, GN), jnp.float32),
        grid_spec=pltpu.PrefetchScalarGridSpec(
            num_scalar_prefetch=0,
            grid=(ngroups,),
            in_specs=[
                pl.BlockSpec((None, GN, GN), lambda i: (i, 0, 0)),   # block-diag A
                pl.BlockSpec((None, D, GN), lambda i: (i, 0, 0)),    # x^T slab
                pl.BlockSpec((2 * D, D), const),                     # [Wd; Wr]
                pl.BlockSpec((D, D), const),                         # w0
                pl.BlockSpec((D, 1), const),                         # gamma * w1
                pl.BlockSpec((1, 1), const),                         # sum(beta * w1)
            ],
            out_specs=pl.BlockSpec((None, 1, GN), lambda i: (i, 0, 0)),
        ),
        compiler_params=pltpu.CompilerParams(
            dimension_semantics=("parallel",),   # independent graph groups -> 2-TC sharding
        ),
    )(a_bd, xt, wdr, w0, w1p, bias)

    out = out.reshape(ngroups, G, N).reshape(Bp, N)[:B]
    return out[0] if single else out


def init_params(key, input_size):
    # init_weights: all nn.Linear weights ~ Normal(0, 0.05); LayerNorm defaults (ones/zeros)
    k1, k2, k3, k4 = jax.random.split(key, 4)
    std = 0.05
    return {
        "wd": std * jax.random.normal(k1, (input_size, input_size), jnp.float32),
        "wr": std * jax.random.normal(k2, (input_size, input_size), jnp.float32),
        "w0": std * jax.random.normal(k3, (input_size, input_size), jnp.float32),
        "w1": std * jax.random.normal(k4, (1, input_size), jnp.float32),
        "ln_gamma": jnp.ones((input_size,), jnp.float32),
        "ln_beta": jnp.zeros((input_size,), jnp.float32),
    }


def gcn_reference(A, x, params):
    """Pure-JAX f32 reference matching the PyTorch forward (single graph, exact erf GELU)."""
    def gelu_exact(v):
        return 0.5 * v * (1.0 + lax.erf(v * (1.0 / math.sqrt(2.0))))

    def layer(xv):
        h = gelu_exact(xv @ params["wd"].T)
        return gelu_exact(xv @ params["wr"].T + A.T @ h)

    xv = layer(layer(x))
    y = gelu_exact(xv @ params["w0"].T)
    mean = jnp.mean(y, axis=-1, keepdims=True)
    var = jnp.mean((y - mean) ** 2, axis=-1, keepdims=True)
    y = (y - mean) * lax.rsqrt(var + 1e-5)
    y = y * params["ln_gamma"] + params["ln_beta"]
    return (y @ params["w1"].T)[:, 0]


if __name__ == "__main__":
    # B=16 graphs of N=16 nodes -> G=8 graphs per grid step, grid=(2,): lane-dense 128-wide
    # blocks and >=2 parallel steps (keeps both v7x TensorCores busy).
    B, N, D = 16, 16, 32
    key = jax.random.PRNGKey(0)
    ka, kx, kp = jax.random.split(key, 3)
    A = jax.random.normal(ka, (B, N, N), jnp.float32)
    x = jax.random.normal(kx, (B, N, D), jnp.float32)
    params = init_params(kp, D)

    out = gcn_forward(A, x, params)                 # batched path: (B, N)
    jax.block_until_ready(out)
    assert out.shape == (B, N)

    out_single = gcn_forward(A[0], x[0], params)    # single-graph path: (N,)
    jax.block_until_ready(out_single)
    assert out_single.shape == (N,)

    # loose tolerance: bf16 MXU operands (f32 accumulation) + tanh-approx GELU in the kernel
    ref = jax.vmap(lambda a, xv: gcn_reference(a, xv, params))(A, x)
    assert jnp.allclose(out, ref, atol=1e-1, rtol=1e-1), float(jnp.max(jnp.abs(out - ref)))
    assert jnp.allclose(out_single, ref[0], atol=1e-1, rtol=1e-1)

    print("KERNEL_OK")
</pallas_src>

<mosaic_0001>
module attributes {stable_mosaic.version = 11 : i64} {
  func.func @gcn_kernel(%arg0: i32, %arg1: memref<1x128x128xbf16, #tpu.memory_space<vmem>>, %arg2: memref<1x32x128xbf16, #tpu.memory_space<vmem>>, %arg3: memref<64x32xbf16, #tpu.memory_space<vmem>>, %arg4: memref<32x32xbf16, #tpu.memory_space<vmem>>, %arg5: memref<32x1xf32, #tpu.memory_space<vmem>>, %arg6: memref<1x1xf32, #tpu.memory_space<vmem>>, %arg7: memref<1x1x128xf32, #tpu.memory_space<vmem>>) attributes {dimension_semantics = [#tpu.dimension_semantics<parallel>], iteration_bounds = array<i64: 2>, scalar_prefetch = 0 : i64, scratch_operands = 0 : i64, tpu.core_type = #tpu.core_type<tc>, window_params = [{transform_indices = @transform_0, window_bounds = array<i64: 1, 128, 128>}, {transform_indices = @transform_1, window_bounds = array<i64: 1, 32, 128>}, {pipeline_mode = #tpu.pipeline_mode<synchronous>, transform_indices = @transform_2, window_bounds = array<i64: 64, 32>}, {pipeline_mode = #tpu.pipeline_mode<synchronous>, transform_indices = @transform_3, window_bounds = array<i64: 32, 32>}, {pipeline_mode = #tpu.pipeline_mode<synchronous>, transform_indices = @transform_4, window_bounds = array<i64: 32, 1>}, {pipeline_mode = #tpu.pipeline_mode<synchronous>, transform_indices = @transform_5, window_bounds = array<i64: 1, 1>}, {transform_indices = @transform_6, window_bounds = array<i64: 1, 1, 128>}]} {
    %c0 = arith.constant 0 : index
    %c0_0 = arith.constant 0 : index
    %c0_1 = arith.constant 0 : index
    %0 = vector.load %arg1[%c0, %c0_0, %c0_1] : memref<1x128x128xbf16, #tpu.memory_space<vmem>>, vector<1x128x128xbf16>
    %1 = vector.shape_cast %0 : vector<1x128x128xbf16> to vector<128x128xbf16>
    %c0_2 = arith.constant 0 : index
    %c0_3 = arith.constant 0 : index
    %2 = vector.load %arg3[%c0_2, %c0_3] : memref<64x32xbf16, #tpu.memory_space<vmem>>, vector<64x32xbf16>
    %c0_4 = arith.constant 0 : index
    %c0_5 = arith.constant 0 : index
    %c0_6 = arith.constant 0 : index
    %3 = vector.load %arg2[%c0_4, %c0_5, %c0_6] : memref<1x32x128xbf16, #tpu.memory_space<vmem>>, vector<1x32x128xbf16>
    %4 = vector.shape_cast %3 : vector<1x32x128xbf16> to vector<32x128xbf16>
    %cst = arith.constant dense<0.000000e+00> : vector<64x128xf32>
    %5 = tpu.matmul %2, %4, %cst {dimension_numbers = #tpu.dot_dimension_numbers<[1], [0], [0], [1], [0, 0, 1, 1], [], []>} : vector<64x32xbf16>, vector<32x128xbf16>, vector<64x128xf32> -> vector<64x128xf32>
    %6 = vector.extract_strided_slice %5 {offsets = [0, 0], sizes = [32, 128], strides = [1, 1]} : vector<64x128xf32> to vector<32x128xf32>
    %cst_7 = arith.constant 5.000000e-01 : f32
    %7 = vector.broadcast %cst_7 : f32 to vector<32x128xf32>
    %8 = arith.mulf %7, %6 : vector<32x128xf32>
    %cst_8 = arith.constant 4.471500e-02 : f32
    %9 = vector.broadcast %cst_8 : f32 to vector<32x128xf32>
    %10 = arith.mulf %9, %6 : vector<32x128xf32>
    %11 = arith.mulf %10, %6 : vector<32x128xf32>
    %12 = arith.mulf %11, %6 : vector<32x128xf32>
    %13 = arith.addf %6, %12 : vector<32x128xf32>
    %cst_9 = arith.constant 0.797884583 : f32
    %14 = vector.broadcast %cst_9 : f32 to vector<32x128xf32>
    %15 = arith.mulf %14, %13 : vector<32x128xf32>
    %16 = math.tanh %15 : vector<32x128xf32>
    %cst_10 = arith.constant 1.000000e+00 : f32
    %17 = vector.broadcast %cst_10 : f32 to vector<32x128xf32>
    %18 = arith.addf %17, %16 : vector<32x128xf32>
    %19 = arith.mulf %8, %18 : vector<32x128xf32>
    %20 = vector.extract_strided_slice %5 {offsets = [32, 0], sizes = [32, 128], strides = [1, 1]} : vector<64x128xf32> to vector<32x128xf32>
    %21 = arith.truncf %19 : vector<32x128xf32> to vector<32x128xbf16>
    %cst_11 = arith.constant dense<0.000000e+00> : vector<32x128xf32>
    %22 = tpu.matmul %21, %1, %cst_11 {dimension_numbers = #tpu.dot_dimension_numbers<[1], [0], [0], [1], [0, 0, 1, 1], [], []>} : vector<32x128xbf16>, vector<128x128xbf16>, vector<32x128xf32> -> vector<32x128xf32>
    %23 = arith.addf %20, %22 : vector<32x128xf32>
    %cst_12 = arith.constant 5.000000e-01 : f32
    %24 = vector.broadcast %cst_12 : f32 to vector<32x128xf32>
    %25 = arith.mulf %24, %23 : vector<32x128xf32>
    %cst_13 = arith.constant 4.471500e-02 : f32
    %26 = vector.broadcast %cst_13 : f32 to vector<32x128xf32>
    %27 = arith.mulf %26, %23 : vector<32x128xf32>
    %28 = arith.mulf %27, %23 : vector<32x128xf32>
    %29 = arith.mulf %28, %23 : vector<32x128xf32>
    %30 = arith.addf %23, %29 : vector<32x128xf32>
    %cst_14 = arith.constant 0.797884583 : f32
    %31 = vector.broadcast %cst_14 : f32 to vector<32x128xf32>
    %32 = arith.mulf %31, %30 : vector<32x128xf32>
    %33 = math.tanh %32 : vector<32x128xf32>
    %cst_15 = arith.constant 1.000000e+00 : f32
    %34 = vector.broadcast %cst_15 : f32 to vector<32x128xf32>
    %35 = arith.addf %34, %33 : vector<32x128xf32>
    %36 = arith.mulf %25, %35 : vector<32x128xf32>
    %37 = arith.truncf %36 : vector<32x128xf32> to vector<32x128xbf16>
    %cst_16 = arith.constant dense<0.000000e+00> : vector<64x128xf32>
    %38 = tpu.matmul %2, %37, %cst_16 {dimension_numbers = #tpu.dot_dimension_numbers<[1], [0], [0], [1], [0, 0, 1, 1], [], []>} : vector<64x32xbf16>, vector<32x128xbf16>, vector<64x128xf32> -> vector<64x128xf32>
    %39 = vector.extract_strided_slice %38 {offsets = [0, 0], sizes = [32, 128], strides = [1, 1]} : vector<64x128xf32> to vector<32x128xf32>
    %cst_17 = arith.constant 5.000000e-01 : f32
    %40 = vector.broadcast %cst_17 : f32 to vector<32x128xf32>
    %41 = arith.mulf %40, %39 : vector<32x128xf32>
    %cst_18 = arith.constant 4.471500e-02 : f32
    %42 = vector.broadcast %cst_18 : f32 to vector<32x128xf32>
    %43 = arith.mulf %42, %39 : vector<32x128xf32>
    %44 = arith.mulf %43, %39 : vector<32x128xf32>
    %45 = arith.mulf %44, %39 : vector<32x128xf32>
    %46 = arith.addf %39, %45 : vector<32x128xf32>
    %cst_19 = arith.constant 0.797884583 : f32
    %47 = vector.broadcast %cst_19 : f32 to vector<32x128xf32>
    %48 = arith.mulf %47, %46 : vector<32x128xf32>
    %49 = math.tanh %48 : vector<32x128xf32>
    %cst_20 = arith.constant 1.000000e+00 : f32
    %50 = vector.broadcast %cst_20 : f32 to vector<32x128xf32>
    %51 = arith.addf %50, %49 : vector<32x128xf32>
    %52 = arith.mulf %41, %51 : vector<32x128xf32>
    %53 = vector.extract_strided_slice %38 {offsets = [32, 0], sizes = [32, 128], strides = [1, 1]} : vector<64x128xf32> to vector<32x128xf32>
    %54 = arith.truncf %52 : vector<32x128xf32> to vector<32x128xbf16>
    %cst_21 = arith.constant dense<0.000000e+00> : vector<32x128xf32>
    %55 = tpu.matmul %54, %1, %cst_21 {dimension_numbers = #tpu.dot_dimension_numbers<[1], [0], [0], [1], [0, 0, 1, 1], [], []>} : vector<32x128xbf16>, vector<128x128xbf16>, vector<32x128xf32> -> vector<32x128xf32>
    %56 = arith.addf %53, %55 : vector<32x128xf32>
    %cst_22 = arith.constant 5.000000e-01 : f32
    %57 = vector.broadcast %cst_22 : f32 to vector<32x128xf32>
    %58 = arith.mulf %57, %56 : vector<32x128xf32>
    %cst_23 = arith.constant 4.471500e-02 : f32
    %59 = vector.broadcast %cst_23 : f32 to vector<32x128xf32>
    %60 = arith.mulf %59, %56 : vector<32x128xf32>
    %61 = arith.mulf %60, %56 : vector<32x128xf32>
    %62 = arith.mulf %61, %56 : vector<32x128xf32>
    %63 = arith.addf %56, %62 : vector<32x128xf32>
    %cst_24 = arith.constant 0.797884583 : f32
    %64 = vector.broadcast %cst_24 : f32 to vector<32x128xf32>
    %65 = arith.mulf %64, %63 : vector<32x128xf32>
    %66 = math.tanh %65 : vector<32x128xf32>
    %cst_25 = arith.constant 1.000000e+00 : f32
    %67 = vector.broadcast %cst_25 : f32 to vector<32x128xf32>
    %68 = arith.addf %67, %66 : vector<32x128xf32>
    %69 = arith.mulf %58, %68 : vector<32x128xf32>
    %c0_26 = arith.constant 0 : index
    %c0_27 = arith.constant 0 : index
    %70 = vector.load %arg4[%c0_26, %c0_27] : memref<32x32xbf16, #tpu.memory_space<vmem>>, vector<32x32xbf16>
    %71 = arith.truncf %69 : vector<32x128xf32> to vector<32x128xbf16>
    %cst_28 = arith.constant dense<0.000000e+00> : vector<32x128xf32>
    %72 = tpu.matmul %70, %71, %cst_28 {dimension_numbers = #tpu.dot_dimension_numbers<[1], [0], [0], [1], [0, 0, 1, 1], [], []>} : vector<32x32xbf16>, vector<32x128xbf16>, vector<32x128xf32> -> vector<32x128xf32>
    %cst_29 = arith.constant 5.000000e-01 : f32
    %73 = vector.broadcast %cst_29 : f32 to vector<32x128xf32>
    %74 = arith.mulf %73, %72 : vector<32x128xf32>
    %cst_30 = arith.constant 4.471500e-02 : f32
    %75 = vector.broadcast %cst_30 : f32 to vector<32x128xf32>
    %76 = arith.mulf %75, %72 : vector<32x128xf32>
    %77 = arith.mulf %76, %72 : vector<32x128xf32>
    %78 = arith.mulf %77, %72 : vector<32x128xf32>
    %79 = arith.addf %72, %78 : vector<32x128xf32>
    %cst_31 = arith.constant 0.797884583 : f32
    %80 = vector.broadcast %cst_31 : f32 to vector<32x128xf32>
    %81 = arith.mulf %80, %79 : vector<32x128xf32>
    %82 = math.tanh %81 : vector<32x128xf32>
    %cst_32 = arith.constant 1.000000e+00 : f32
    %83 = vector.broadcast %cst_32 : f32 to vector<32x128xf32>
    %84 = arith.addf %83, %82 : vector<32x128xf32>
    %85 = arith.mulf %74, %84 : vector<32x128xf32>
    %cst_33 = arith.constant dense<0.000000e+00> : vector<128xf32>
    %86 = vector.multi_reduction <add>, %85, %cst_33 [0] : vector<32x128xf32> to vector<128xf32>
    %87 = vector.shape_cast %86 : vector<128xf32> to vector<1x128xf32>
    %cst_34 = arith.constant 3.200000e+01 : f32
    %88 = vector.broadcast %cst_34 : f32 to vector<1x128xf32>
    %89 = arith.divf %87, %88 : vector<1x128xf32>
    %90 = arith.mulf %85, %85 : vector<32x128xf32>
    %cst_35 = arith.constant dense<0.000000e+00> : vector<128xf32>
    %91 = vector.multi_reduction <add>, %90, %cst_35 [0] : vector<32x128xf32> to vector<128xf32>
    %92 = vector.shape_cast %91 : vector<128xf32> to vector<1x128xf32>
    %cst_36 = arith.constant 3.200000e+01 : f32
    %93 = vector.broadcast %cst_36 : f32 to vector<1x128xf32>
    %94 = arith.divf %92, %93 : vector<1x128xf32>
    %95 = arith.mulf %89, %89 : vector<1x128xf32>
    %96 = arith.subf %94, %95 : vector<1x128xf32>
    %cst_37 = arith.constant 0.000000e+00 : f32
    %97 = vector.broadcast %cst_37 : f32 to vector<1x128xf32>
    %98 = arith.maximumf %96, %97 : vector<1x128xf32>
    %99 = vector.broadcast %89 : vector<1x128xf32> to vector<32x128xf32>
    %100 = arith.subf %85, %99 : vector<32x128xf32>
    %cst_38 = arith.constant 9.99999974E-6 : f32
    %101 = vector.broadcast %cst_38 : f32 to vector<1x128xf32>
    %102 = arith.addf %98, %101 : vector<1x128xf32>
    %103 = math.rsqrt %102 : vector<1x128xf32>
    %104 = vector.broadcast %103 : vector<1x128xf32> to vector<32x128xf32>
    %105 = arith.mulf %100, %104 : vector<32x128xf32>
    %c0_39 = arith.constant 0 : index
    %c0_40 = arith.constant 0 : index
    %106 = vector.load %arg5[%c0_39, %c0_40] : memref<32x1xf32, #tpu.memory_space<vmem>>, vector<32x1xf32>
    %107 = vector.broadcast %106 : vector<32x1xf32> to vector<32x128xf32>
    %108 = arith.mulf %105, %107 : vector<32x128xf32>
    %cst_41 = arith.constant dense<0.000000e+00> : vector<128xf32>
    %109 = vector.multi_reduction <add>, %108, %cst_41 [0] : vector<32x128xf32> to vector<128xf32>
    %110 = vector.shape_cast %109 : vector<128xf32> to vector<1x128xf32>
    %c0_42 = arith.constant 0 : index
    %c0_43 = arith.constant 0 : index
    %111 = vector.load %arg6[%c0_42, %c0_43] : memref<1x1xf32, #tpu.memory_space<vmem>>, vector<1x1xf32>
    %112 = vector.broadcast %111 : vector<1x1xf32> to vector<1x128xf32>
    %113 = arith.addf %110, %112 : vector<1x128xf32>
    %c0_44 = arith.constant 0 : index
    %c0_45 = arith.constant 0 : index
    %c0_46 = arith.constant 0 : index
    %114 = vector.load %arg7[%c0_44, %c0_45, %c0_46] : memref<1x1x128xf32, #tpu.memory_space<vmem>>, vector<1x1x128xf32>
    %115 = vector.shape_cast %114 : vector<1x1x128xf32> to vector<1x128xf32>
    %116 = vector.shape_cast %113 : vector<1x128xf32> to vector<1x1x128xf32>
    tpu.vector_store %arg7[%c0_44, %c0_45, %c0_46], %116 {strides = array<i32>} : memref<1x1x128xf32, #tpu.memory_space<vmem>>, vector<1x1x128xf32>,
    return
  }
  func.func @transform_0(%arg0: i32) -> (i32, i32, i32) {
    %c0_i32 = arith.constant 0 : i32
    %c0_i32_0 = arith.constant 0 : i32
    %c0_i32_1 = arith.constant 0 : i32
    return %arg0, %c0_i32, %c0_i32_0 : i32, i32, i32
  }
  func.func @transform_1(%arg0: i32) -> (i32, i32, i32) {
    %c0_i32 = arith.constant 0 : i32
    %c0_i32_0 = arith.constant 0 : i32
    %c0_i32_1 = arith.constant 0 : i32
    return %arg0, %c0_i32, %c0_i32_0 : i32, i32, i32
  }
  func.func @transform_2(%arg0: i32) -> (i32, i32) {
    %c0_i32 = arith.constant 0 : i32
    %c0_i32_0 = arith.constant 0 : i32
    %c0_i32_1 = arith.constant 0 : i32
    return %c0_i32, %c0_i32_0 : i32, i32
  }
  func.func @transform_3(%arg0: i32) -> (i32, i32) {
    %c0_i32 = arith.constant 0 : i32
    %c0_i32_0 = arith.constant 0 : i32
    %c0_i32_1 = arith.constant 0 : i32
    return %c0_i32, %c0_i32_0 : i32, i32
  }
  func.func @transform_4(%arg0: i32) -> (i32, i32) {
    %c0_i32 = arith.constant 0 : i32
    %c0_i32_0 = arith.constant 0 : i32
    %c0_i32_1 = arith.constant 0 : i32
    return %c0_i32, %c0_i32_0 : i32, i32
  }
  func.func @transform_5(%arg0: i32) -> (i32, i32) {
    %c0_i32 = arith.constant 0 : i32
    %c0_i32_0 = arith.constant 0 : i32
    %c0_i32_1 = arith.constant 0 : i32
    return %c0_i32, %c0_i32_0 : i32, i32
  }
  func.func @transform_6(%arg0: i32) -> (i32, i32, i32) {
    %c0_i32 = arith.constant 0 : i32
    %c0_i32_0 = arith.constant 0 : i32
    %c0_i32_1 = arith.constant 0 : i32
    return %arg0, %c0_i32, %c0_i32_0 : i32, i32, i32
  }
}

</mosaic_0001>

<bundles_post_ra>
// kernel: tpu_custom_call.1
= control target key start
LH: loop header
LB: loop body
LE: loop exit
PB: predicated region body
PF: predicated region fallthrough
CT: control target
= control target key end

     0   :  { %s1767_s0 = inlined_call_operand.hbm [shape: bf16[2,128,128], index: 0, kind: input, shape index: {}]   ;;  %s1768_s1 = inlined_call_operand.vmem [shape: bf16[2,32,128], index: 1, kind: input, shape index: {}]   ;;  %s1769_s2 = inlined_call_operand.vmem [shape: bf16[64,32], index: 2, kind: input, shape index: {}]   ;;  %s1770_s3 = inlined_call_operand.vmem [shape: bf16[32,32], index: 3, kind: input, shape index: {}]   ;;  %s1771_s4 = inlined_call_operand.vmem [shape: f32[32,1], index: 4, kind: input, shape index: {}]   ;;  %s1772_s5 = inlined_call_operand.<no memory space> [shape: f32[1,1], index: 5, kind: input, shape index: {}]   ;;  %s1773_s6 = inlined_call_operand.hbm [shape: f32[2,1,128], index: 6, kind: output, shape index: {}]  }
   0x1   :  { %v11_v0 = vstv %s1772_s5 }
   0x2   :  { %12 = vst [vmem:[#allocation2] sm:$0x1] %v11_v0 }
   0x3   :  { %13 = vsyncpa [#allocation4], 0 }
   0x4   :  { %15 = vsyncpa [#allocation4 + $0x1], 0 }
   0x5   :  { %16 = vsyncpa [#allocation5], 0 }
   0x6   :  { %18 = vsyncpa [#allocation5 + $0x1], 0  ;;  %s1491_s23 = smov 0   ;;  %s1493_s24 = smov 0  }
   0x7   :  { %s1495_s25 = smov 0   ;;  %s1497_s26 = smov 0  }
   0x8 LB: > { %s1512_s5 = sadd.s32 4294967295, %s1446_s26   ;;  %s1084_s27 = sadd.s32 4294967294, %s1446_s26   ;;  %s1446_s26 = sphi %s1497_s26, %s1786_s26   ;;  %s1442_s25 = sphi %s1495_s25, %s1785_s25   ;;  %s1438_s24 = sphi %s1493_s24, %s1784_s24   ;;  %s1434_s23 = sphi %s1491_s23, %s1783_s23  }
   0x9   : > { %s1516_s28 = sadd.s32 1, %s1446_s26   ;;  %s31_s29 = sadd.s32 1, %s1442_s25 }
   0xa   : > { %s28_s30 = ssub.s32 %s1446_s26, %s1516_s28  ;;  %p38_p0 = scmp.ne.s32.totalorder %s1442_s25, %s1438_s24 }
   0xb   : > { %p29_p1 = scmp.eq.s32.totalorder %s28_s30, 0  ;;  %p39_p2 = scmp.eq.s32.totalorder %s1446_s26, 0 }
   0xc   : > { %p44_p3 = scmp.ne.s32.totalorder %s1438_s24, %s1434_s23  ;;  %p45_p4 = scmp.eq.s32.totalorder %s1512_s5, 0 }
   0xd   : > { %s1528_s7 = scalar_select %p29_p1, %s1442_s25, %s31_s29  }
   0xe   : > { %p1530_p5 = por %p39_p2, %p38_p0  ;;  %p1534_p6 = por %p45_p4, %p44_p3 }
   0xf   : > { %p178_p7 = scmp.eq.s32.totalorder %s1512_s5, 1  ;;  %p184_p8 = scmp.eq.s32.totalorder %s1084_s27, 1 }
  0x10   : > { %p1253_p10 = scmp.lt.s32.totalorder %s1446_s26, 2  ;;  %s216_s12 = sand.u32 1, %s1442_s25  }
  0x11   : > { %p1541_p11 = por %p178_p7, %p38_p0  ;;  %p1545_p12 = por %p184_p8, %p44_p3 }
  0x12   : > { %s1123_s13 = sshll.u32 %s1446_s26, 10  ;;  %s1087_s14 = sshll.u32 %s216_s12, 6 }
  0x13   : > { %s1777_s10 = scalar_select %p1541_p11, 1, 0 }
  0x14   : > { %s1778_s11 = scalar_select %p1545_p12, 1, 0 }
  0x15   : > { %s1554_s17 = scalar_lea.hbm %s1767_s0, %s1123_s13  ;;  %s220_s18 = scalar_lea.vmem [#allocation3], %s1087_s14 }
  0x16   : > { %s227_s19 = sshll.u32 %s220_s18, 4  ;;  %p1558_p13 = pnand %p1253_p10, %p1530_p5  ;;  %s1562_s19 = int_to_ptr.vmem [resolvable:$true] %s227_s19 }
  0x17   : > { %s1564_s21 = scalar_lea.sflag [#allocation4], %s216_s12  ;;  %s1350_s22 = scalar_lea.hbm %s1554_s17, 1024 }
  0x18   : > { %p1351_p0 = scmp.ne.s32.totalorder %s1554_s17, %s1350_s22  ;;  %p1352_p1 = pneg %p1558_p13 }
  0x19   : > { %s1355_s30 = scalar_lea.hbm %s1767_s0, 2048  ;;  %p1356_p4 = scmp.lt.u32.totalorder %s1554_s17, %s1767_s0 }
  0x1a   : > { %p1353_p2 = pnand %p1352_p1, %p1351_p0  ;;  %p1357_p5 = scmp.lt.u32.totalorder %s1355_s30, %s1350_s22 }
  0x1b   : > { %p1359_p8 = scmp.lt.u32.totalorder %s1350_s22, %s1554_s17 }
  0x1c   : > { %p1354_p3 = pneg %p1353_p2  ;;  %p1358_p7 = por %p1357_p5, %p1356_p4 }
  0x1e   : > { %p1360_p10 = por %p1359_p8, %p1358_p7 }
  0x20   : > { %p1361_p9 = pnand %p1360_p10, %p1354_p3 }
  0x22   : > { %1364 = shalt.err (!%p1361_p9)
}
  0x23   : > { %s1365_s12 = scalar_lea.vmem %s1562_s19, 1024  ;;  %s1448_s14 = smov [#allocation3]  }
  0x24   : > { %p1366_p0 = scmp.ne.s32.totalorder %s1562_s19, %s1365_s12  ;;  %s1370_s15 = sshll.u32 %s1448_s14, 4  ;;  %s1371_s15 = int_to_ptr.vmem [resolvable:$false] %s1370_s15 }
  0x25   : > { %s1372_s16 = scalar_lea.vmem %s1371_s15, 2048  ;;  %p1373_p11 = scmp.lt.s32.totalorder %s1562_s19, %s1371_s15 }
  0x26   : > { %p1368_p2 = pnand %p1366_p0, %p1352_p1  ;;  %p1374_p4 = scmp.lt.s32.totalorder %s1372_s16, %s1365_s12 }
  0x28   : > { %p1369_p12 = pneg %p1368_p2  ;;  %p1375_p5 = por %p1374_p4, %p1373_p11 }
  0x2a   : > { %p1376_p7 = pnand %p1375_p5, %p1369_p12 }
  0x2c   : > { %1379 = shalt.err (!%p1376_p7)
}
  0x2d   : > { %s1449_s18 = smov 64   ;;  %s1450_s22 = smov 4  }
  0x2e   : > { %1248 = dma.hbm_to_vmem [thread:$0]  (!%p1558_p13), %s1554_s17, 1024, %s1562_s19, %s1564_s21, %s1449_s18, %s1449_s18, %s1450_s22  }
  0x2f   : > { %p1090_p9 = scmp.ge.s32.totalorder %s1446_s26, 1  ;;  %p243_p1 = scmp.lt.s32.totalorder %s1446_s26, 3 }
  0x31   : > { %p244_p3 = pnand %p1090_p9, %p243_p1 }
  0x32   : > { %s1595_s27 = sand.u32 (!%p244_p3), 1, %s1438_s24  }
  0x33   : > { %247 = sbr.rel (%p244_p3) target bundleno = 1377 (0x561), region = 44  ;;  %s1091_s29 = sshll.u32 (!%p244_p3), %s1595_s27, 6 }
  0x34   : > { %s250_s30 = scalar_lea.sflag (!%p244_p3), [#allocation4], %s1595_s27  ;;  %s1599_s8 = scalar_lea.vmem (!%p244_p3), [#allocation3], %s1091_s29 }
  0x3a   : > { %1425 = dma.done.wait (%p1534_p6), %s250_s30, 1024  }
  0x3b   : > { %1427 = vsyncadd (%p1534_p6), %s250_s30, 4294966272  ;;  %p286_p11 = scmp.lt.s32.totalorder %s1512_s5, 1  ;;  %vm352_vm0 = vcmask 261120   ;;  %v1294_v3 = vld [vmem:[%s1769_s2] sm:$0xff]   ;;  %v1617_v4 = vld [vmem:[%s1769_s2 + $0x8] sm:$0xff]   ;;  %s1120_s18 = sshll.u32 %s1512_s5, 4 }
  0x3c   : > { %1165 = vmatprep.mubr.msk.bf16.mxu0 %vm352_vm0, %v1294_v3  ;;  %1197 = vmatprep.mubr.msk.bf16.mxu1 %vm352_vm0, %v1294_v3  ;;  %v1623_v5 = vld [vmem:[%s1599_s8] sm:$0xff]   ;;  %v1628_v6 = vld [vmem:[%s1599_s8 + $0x8] sm:$0xff]   ;;  %v1633_v7 = vld [vmem:[%s1599_s8 + $0x10] sm:$0xff]   ;;  %s285_s22 = scalar_lea.vmem [#allocation6], %s1595_s27  ;;  %p1780_p12 = scmp.ne.s32.totalorder %s1777_s10, 0 }
  0x3d   : > { %s287_s17 = scalar_select %p286_p11, %s1512_s5, 1  ;;  %v1638_v8 = vld [vmem:[%s1599_s8 + $0x18] sm:$0xff]   ;;  %v1643_v9 = vld [vmem:[%s1599_s8 + $0x20] sm:$0xff]   ;;  %v1650_v10 = vld [vmem:[%s1769_s2 + $0x10] sm:$0xff]  }
  0x3e   : > { %v1655_v11 = vld [vmem:[%s1769_s2 + $0x18] sm:$0xff]   ;;  %v1658_v12 = vld [vmem:[%s1599_s8 + $0x28] sm:$0xff]   ;;  %s1006_s29 = sshll.u32 %s285_s22, 4  ;;  %s1452_s5 = smov [#allocation6]   ;;  %s1725_s29 = int_to_ptr.vmem [resolvable:$true] %s1006_s29 }
  0x3f   : > { %s1124_s19 = sshll.u32 %s287_s17, 4  ;;  %v1667_v13 = vld [vmem:[%s1599_s8 + $0x30] sm:$0xff]   ;;  %v1672_v14 = vld [vmem:[%s1599_s8 + $0x38] sm:$0xff]   ;;  %s1723_s17 = scalar_lea.hbm %s1773_s6, %s1120_s18 }
  0x40   : > { %s290_s13 = scalar_lea.vmem %s1768_s1, %s1124_s19  ;;  %s994_s19 = scalar_lea.sflag [#allocation5], %s1595_s27 }
  0x41   : > { %v1292_v1 = vld [vmem:[%s290_s13] sm:$0xff]   ;;  %v1293_v2 = vld [vmem:[%s290_s13 + $0x8] sm:$0xff]   ;;  %s1380_s20 = scalar_lea.vmem %s1725_s29, 16  ;;  %s1384_s21 = sshll.u32 %s1452_s5, 4  ;;  %s1385_s21 = int_to_ptr.vmem [resolvable:$false] %s1384_s21 }
  0x42   : > { %1161 = vmatprep.subr.bf16.mxu0 %v1292_v1  ;;  %p1381_p6 = scmp.ne.s32.totalorder %s1725_s29, %s1380_s20  ;;  %s1386_s13 = scalar_lea.vmem %s1385_s21, 32 }
  0x43   : > { %1162 = vmatpush3.bf16.msra.mxu0 %v1292_v1  ;;  %p1387_p10 = scmp.lt.s32.totalorder %s1725_s29, %s1385_s21  ;;  %p1388_p0 = scmp.lt.s32.totalorder %s1386_s13, %s1380_s20 }
  0x44   : > { %1163 = vmatprep.subr.bf16.mxu0 %v1293_v2  ;;  %p1382_p13 = pnand %p1381_p6, %p1780_p12 }
  0x45   : > { %p1389_p2 = por %p1388_p0, %p1387_p10 }
  0x46   : > { %p1383_p8 = pneg %p1382_p13 }
  0x47   : > { %1164 = vmatpush3.bf16.msra.mxu0 %v1293_v2 }
  0x48   : > { %1173 = vmatprep.subr.bf16.mxu0 %v1623_v5  ;;  %p1390_p4 = pnand %p1389_p2, %p1383_p8 }
  0x4a   : > { %1166 = vmatmul.mubr.msk.bf16.vlgmr.msra.gmra.mrb[0].mxu0 %vm352_vm0, %v1617_v4 }
  0x4b   : > { %1174 = vmatpush3.bf16.msra.mxu0 %v1623_v5  ;;  %1169 = vmatprep.mubr.msk.bf16.mxu0 %vm352_vm0, %v1650_v10 }
  0x4c   : > { %1175 = vmatprep.subr.bf16.mxu0 %v1628_v6 }
  0x4f   : > { %1176 = vmatpush3.bf16.msra.mxu0 %v1628_v6 }
  0x50   : > { %1177 = vmatprep.subr.bf16.mxu0 %v1633_v7 }
  0x52   : > { %1170 = vmatmul.mubr.msk.bf16.gmra.mrb[4].mxu0 %vm352_vm0, %v1655_v11 }
  0x53   : > { %1178 = vmatpush3.bf16.msra.mxu0 %v1633_v7 }
  0x54   : > { %1179 = vmatprep.subr.bf16.mxu0 %v1638_v8 }
  0x57   : > { %1180 = vmatpush3.bf16.msra.mxu0 %v1638_v8 }
  0x58   : > { %1181 = vmatprep.subr.bf16.mxu0 %v1643_v9 }
  0x5b   : > { %1182 = vmatpush3.bf16.msra.mxu0 %v1643_v9 }
  0x5c   : > { %1183 = vmatprep.subr.bf16.mxu0 %v1658_v12 }
  0x5f   : > { %1184 = vmatpush3.bf16.msra.mxu0 %v1658_v12 }
  0x60   : > { %1185 = vmatprep.subr.bf16.mxu0 %v1667_v13 }
  0x63   : > { %1186 = vmatpush3.bf16.msra.mxu0 %v1667_v13 }
  0x64   : > { %1187 = vmatprep.subr.bf16.mxu0 %v1672_v14 }
  0x67   : > { %1188 = vmatpush3.bf16.msra.mxu0 %v1672_v14 }
 0x11d   : > { %v1167_v15 = vpop.f32.mrb[0].mxu0 }
 0x11e   : > { %v436_v16 = vmul.f32 0.044715, %v1167_v15  ;;  %v399_v17 = vpop.f32.mrb[1].mxu0  ;;  %v432_v45 = vmul.f32 0.5, %v1167_v15 }
 0x11f   : > { %v434_v18 = vmul.f32 0.044715, %v399_v17  ;;  %v1168_v19 = vpop.f32.mrb[2].mxu0  ;;  %v430_v48 = vmul.f32 0.5, %v399_v17 }
 0x120   : > { %v440_v20 = vmul.f32 %v1167_v15, %v436_v16  ;;  %v437_v21 = vmul.f32 0.044715, %v1168_v19  ;;  %v402_v22 = vpop.f32.mrb[3].mxu0  ;;  %v433_v46 = vmul.f32 0.5, %v1168_v19 }
 0x121   : > { %v438_v23 = vmul.f32 %v434_v18, %v399_v17  ;;  %v435_v24 = vmul.f32 0.044715, %v402_v22  ;;  %v431_v49 = vmul.f32 0.5, %v402_v22 }
 0x122   : > { %v444_v25 = vmul.f32 %v1167_v15, %v440_v20  ;;  %v441_v26 = vmul.f32 %v1168_v19, %v437_v21 }
 0x123   : > { %v442_v27 = vmul.f32 %v438_v23, %v399_v17  ;;  %v439_v28 = vmul.f32 %v435_v24, %v402_v22 }
 0x124   : > { %v448_v29 = vadd.f32 %v1167_v15, %v444_v25  ;;  %v445_v30 = vmul.f32 %v1168_v19, %v441_v26 }
 0x125   : > { %v446_v31 = vadd.f32 %v442_v27, %v399_v17  ;;  %v443_v32 = vmul.f32 %v439_v28, %v402_v22 }
 0x126   : > { %v452_v33 = vmul.f32 0.7978846, %v448_v29  ;;  %v449_v34 = vadd.f32 %v1168_v19, %v445_v30 }
 0x127   : > { %v450_v35 = vmul.f32 0.7978846, %v446_v31  ;;  %v447_v36 = vadd.f32 %v443_v32, %v402_v22 }
 0x128   : > { %1308 = vtanh.f32 %v452_v33  ;;  %v453_v37 = vmul.f32 0.7978846, %v449_v34 }
 0x129   : > { %1310 = vtanh.f32 %v450_v35  ;;  %v451_v38 = vmul.f32 0.7978846, %v447_v36 }
 0x12a   : > { %1312 = vtanh.f32 %v453_v37 }
 0x12b   : > { %1314 = vtanh.f32 %v451_v38 }
 0x132   : > { %v1309_v39 = vpop.eup %1308 }
 0x133   : > { %v1311_v40 = vpop.eup %1310  ;;  %v460_v41 = vadd.f32 1.0, %v1309_v39 }
 0x134   : > { %v1313_v42 = vpop.eup %1312  ;;  %v458_v43 = vadd.f32 1.0, %v1311_v40 }
 0x135   : > { %v1315_v44 = vpop.eup %1314  ;;  %v461_v47 = vadd.f32 1.0, %v1313_v42  ;;  %v464_v51 = vmul.f32 %v460_v41, %v432_v45 }
 0x136   : > { %v459_v50 = vadd.f32 1.0, %v1315_v44  ;;  %v462_v53 = vmul.f32 %v458_v43, %v430_v48 }
 0x137   : > { %v465_v52 = vmul.f32 %v461_v47, %v433_v46 }
 0x138   : > { %v463_v54 = vmul.f32 %v459_v50, %v431_v49 }
 0x139   : > { %v467_v55 = vpack.c.bf16 %v465_v52, %v464_v51 }
 0x13a   : > { %v466_v56 = vpack.c.bf16 %v463_v54, %v462_v53 }
 0x13c   : > { %1189 = vmatprep.mubr.bf16.mxu0 %v466_v56 }
 0x13d   : > { %1190 = vmatmul.mubr.bf16.vlgmr.msra.gmra.mrb[4].mxu0 %v467_v55 }
 0x210   : > { %v1191_v57 = vpop.f32.mrb[4].mxu0 }
 0x211   : > { %v575_v58 = vmul.f32 0.044715, %v1191_v57  ;;  %v550_v59 = vpop.f32.mrb[5].mxu0  ;;  %v571_v34 = vmul.f32 0.5, %v1191_v57 }
 0x212   : > { %v573_v60 = vmul.f32 0.044715, %v550_v59  ;;  %v1192_v61 = vpop.f32.mrb[6].mxu0  ;;  %v569_v37 = vmul.f32 0.5, %v550_v59 }
 0x213   : > { %v579_v62 = vmul.f32 %v1191_v57, %v575_v58  ;;  %v576_v63 = vmul.f32 0.044715, %v1192_v61  ;;  %v553_v0 = vpop.f32.mrb[7].mxu0  ;;  %v572_v35 = vmul.f32 0.5, %v1192_v61 }
 0x214   : > { %v577_v1 = vmul.f32 %v573_v60, %v550_v59  ;;  %v574_v2 = vmul.f32 0.044715, %v553_v0  ;;  %v570_v38 = vmul.f32 0.5, %v553_v0 }
 0x215   : > { %v583_v3 = vmul.f32 %v1191_v57, %v579_v62  ;;  %v580_v15 = vmul.f32 %v1192_v61, %v576_v63 }
 0x216   : > { %v581_v16 = vmul.f32 %v577_v1, %v550_v59  ;;  %v578_v17 = vmul.f32 %v574_v2, %v553_v0 }
 0x217   : > { %v587_v18 = vadd.f32 %v1191_v57, %v583_v3  ;;  %v584_v19 = vmul.f32 %v1192_v61, %v580_v15 }
 0x218   : > { %v585_v20 = vadd.f32 %v581_v16, %v550_v59  ;;  %v582_v21 = vmul.f32 %v578_v17, %v553_v0 }
 0x219   : > { %v591_v22 = vmul.f32 0.7978846, %v587_v18  ;;  %v588_v23 = vadd.f32 %v1192_v61, %v584_v19 }
 0x21a   : > { %v586_v24 = vadd.f32 %v582_v21, %v553_v0  ;;  %v589_v25 = vmul.f32 0.7978846, %v585_v20 }
 0x21b   : > { %1316 = vtanh.f32 %v591_v22  ;;  %v592_v26 = vmul.f32 0.7978846, %v588_v23 }
 0x21c   : > { %v590_v27 = vmul.f32 0.7978846, %v586_v24  ;;  %1318 = vtanh.f32 %v589_v25  ;;  %v1306_v24 = vld [vmem:[%s1770_s3] sm:$0xff]  }
 0x21d   : > { %1320 = vtanh.f32 %v592_v26  ;;  %1229 = vmatprep.mubr.msk.bf16.mxu0 %vm352_vm0, %v1306_v24  ;;  %v944_v25 = vld [vmem:[%s1771_s4] sm:$0xff]  ;;  %v946_v26 = vld [vmem:[%s1771_s4 + $0x10] sm:$0xff] }
 0x21e   : > { %1322 = vtanh.f32 %v590_v27  ;;  %v1451_v27 = vmov 0  }
 0x21f   : > { %1290 = vset.pattern.permute.xlu0 %v1451_v27  ;;  %1291 = vset.pattern.permute.xlu1 %v1451_v27 }
 0x220   : > { %950 = vperm.xlu0 %1290, %v944_v25   ;;  %960 = vperm.xlu1 %1291, %v946_v26  }
 0x225   : > { %v1317_v28 = vpop.eup %1316 }
 0x226   : > { %v1319_v29 = vpop.eup %1318  ;;  %v599_v30 = vadd.f32 1.0, %v1317_v28  ;;  %v945_v28 = vld [vmem:[%s1771_s4 + $0x8] sm:$0xff] }
 0x227   : > { %v1321_v31 = vpop.eup %1320  ;;  %v597_v32 = vadd.f32 1.0, %v1319_v29  ;;  %v947_v29 = vld [vmem:[%s1771_s4 + $0x18] sm:$0xff]  ;;  %955 = vperm.xlu0 %1290, %v945_v28  }
 0x228   : > { %v1323_v33 = vpop.eup %1322  ;;  %v600_v36 = vadd.f32 1.0, %v1321_v31  ;;  %v603_v40 = vmul.f32 %v599_v30, %v571_v34  ;;  %965 = vperm.xlu1 %1291, %v947_v29   ;;  %v981_v30 = vld [vmem:[#allocation2] sm:$0x1] }
 0x229   : > { %v598_v39 = vadd.f32 1.0, %v1323_v33  ;;  %v601_v42 = vmul.f32 %v597_v32, %v569_v37 }
 0x22a   : > { %v604_v41 = vmul.f32 %v600_v36, %v572_v35 }
 0x22b   : > { %v602_v43 = vmul.f32 %v598_v39, %v570_v38  ;;  %984 = vperm.xlu0 %1290, %v981_v30  }
 0x22c   : > { %v606_v44 = vpack.c.bf16 %v604_v41, %v603_v40 }
 0x22d   : > { %v605_v45 = vpack.c.bf16 %v602_v43, %v601_v42 }
 0x22f   : > { %1193 = vmatprep.subr.bf16.mxu1 %v605_v45 }
 0x230   : > { %1194 = vmatpush3.bf16.msra.mxu1 %v605_v45 }
 0x231   : > { %1195 = vmatprep.subr.bf16.mxu1 %v606_v44 }
 0x234   : > { %1196 = vmatpush3.bf16.msra.mxu1 %v606_v44 }
 0x235   : > { %1205 = vmatprep.subr.bf16.mxu1 %v1623_v5 }
 0x237   : > { %1198 = vmatmul.mubr.msk.bf16.vlgmr.msra.gmra.mrb[0].mxu1 %vm352_vm0, %v1617_v4 }
 0x238   : > { %1206 = vmatpush3.bf16.msra.mxu1 %v1623_v5  ;;  %1201 = vmatprep.mubr.msk.bf16.mxu1 %vm352_vm0, %v1650_v10 }
 0x239   : > { %1207 = vmatprep.subr.bf16.mxu1 %v1628_v6 }
 0x23c   : > { %1208 = vmatpush3.bf16.msra.mxu1 %v1628_v6 }
 0x23d   : > { %1209 = vmatprep.subr.bf16.mxu1 %v1633_v7 }
 0x23f   : > { %1202 = vmatmul.mubr.msk.bf16.gmra.mrb[4].mxu1 %vm352_vm0, %v1655_v11 }
 0x240   : > { %1210 = vmatpush3.bf16.msra.mxu1 %v1633_v7 }
 0x241   : > { %1211 = vmatprep.subr.bf16.mxu1 %v1638_v8 }
 0x244   : > { %1212 = vmatpush3.bf16.msra.mxu1 %v1638_v8 }
 0x245   : > { %1213 = vmatprep.subr.bf16.mxu1 %v1643_v9 }
 0x248   : > { %1214 = vmatpush3.bf16.msra.mxu1 %v1643_v9 }
 0x249   : > { %1215 = vmatprep.subr.bf16.mxu1 %v1658_v12 }
 0x24c   : > { %1216 = vmatpush3.bf16.msra.mxu1 %v1658_v12 }
 0x24d   : > { %1217 = vmatprep.subr.bf16.mxu1 %v1667_v13 }
 0x250   : > { %1218 = vmatpush3.bf16.msra.mxu1 %v1667_v13 }
 0x251   : > { %1219 = vmatprep.subr.bf16.mxu1 %v1672_v14 }
 0x254   : > { %1220 = vmatpush3.bf16.msra.mxu1 %v1672_v14 }
 0x30a   : > { %v1199_v4 = vpop.f32.mrb[0].mxu1 }
 0x30b   : > { %v678_v5 = vmul.f32 0.044715, %v1199_v4  ;;  %v641_v6 = vpop.f32.mrb[1].mxu1  ;;  %v674_v1 = vmul.f32 0.5, %v1199_v4 }
 0x30c   : > { %v676_v7 = vmul.f32 0.044715, %v641_v6  ;;  %v1200_v8 = vpop.f32.mrb[2].mxu1  ;;  %v672_v15 = vmul.f32 0.5, %v641_v6 }
 0x30d   : > { %v682_v10 = vmul.f32 %v1199_v4, %v678_v5  ;;  %v679_v11 = vmul.f32 0.044715, %v1200_v8  ;;  %v644_v9 = vpop.f32.mrb[3].mxu1  ;;  %v675_v2 = vmul.f32 0.5, %v1200_v8 }
 0x30e   : > { %v680_v46 = vmul.f32 %v676_v7, %v641_v6  ;;  %v677_v47 = vmul.f32 0.044715, %v644_v9  ;;  %v673_v16 = vmul.f32 0.5, %v644_v9 }
 0x30f   : > { %v686_v48 = vmul.f32 %v1199_v4, %v682_v10  ;;  %v683_v12 = vmul.f32 %v1200_v8, %v679_v11 }
 0x310   : > { %v684_v49 = vmul.f32 %v680_v46, %v641_v6  ;;  %v681_v50 = vmul.f32 %v677_v47, %v644_v9 }
 0x311   : > { %v690_v51 = vadd.f32 %v1199_v4, %v686_v48  ;;  %v687_v13 = vmul.f32 %v1200_v8, %v683_v12 }
 0x312   : > { %v688_v52 = vadd.f32 %v684_v49, %v641_v6  ;;  %v685_v53 = vmul.f32 %v681_v50, %v644_v9 }
 0x313   : > { %v694_v54 = vmul.f32 0.7978846, %v690_v51  ;;  %v691_v14 = vadd.f32 %v1200_v8, %v687_v13 }
 0x314   : > { %v692_v55 = vmul.f32 0.7978846, %v688_v52  ;;  %v689_v56 = vadd.f32 %v685_v53, %v644_v9 }
 0x315   : > { %1324 = vtanh.f32 %v694_v54  ;;  %v695_v57 = vmul.f32 0.7978846, %v691_v14 }
 0x316   : > { %1326 = vtanh.f32 %v692_v55  ;;  %v693_v58 = vmul.f32 0.7978846, %v689_v56 }
 0x317   : > { %1328 = vtanh.f32 %v695_v57 }
 0x318   : > { %1330 = vtanh.f32 %v693_v58 }
 0x31f   : > { %v1325_v59 = vpop.eup %1324 }
 0x320   : > { %v1327_v60 = vpop.eup %1326  ;;  %v702_v61 = vadd.f32 1.0, %v1325_v59 }
 0x321   : > { %v1329_v62 = vpop.eup %1328  ;;  %v700_v63 = vadd.f32 1.0, %v1327_v60 }
 0x322   : > { %v1331_v0 = vpop.eup %1330  ;;  %v703_v3 = vadd.f32 1.0, %v1329_v62  ;;  %v706_v18 = vmul.f32 %v702_v61, %v674_v1  ;;  %v1307_v62 = vld [vmem:[%s1770_s3 + $0x8] sm:$0xff]  }
 0x323   : > { %v701_v17 = vadd.f32 1.0, %v1331_v0  ;;  %v704_v20 = vmul.f32 %v700_v63, %v672_v15 }
 0x324   : > { %v707_v19 = vmul.f32 %v703_v3, %v675_v2 }
 0x325   : > { %v705_v21 = vmul.f32 %v701_v17, %v673_v16 }
 0x326   : > { %v709_v22 = vpack.c.bf16 %v707_v19, %v706_v18 }
 0x327   : > { %v708_v23 = vpack.c.bf16 %v705_v21, %v704_v20 }
 0x329   : > { %1221 = vmatprep.mubr.bf16.mxu1 %v708_v23 }
 0x32a   : > { %1222 = vmatmul.mubr.bf16.vlgmr.msra.gmra.mrb[4].mxu1 %v709_v22 }
 0x3fd   : > { %v1223_v31 = vpop.f32.mrb[4].mxu1 }
 0x3fe   : > { %v769_v32 = vmul.f32 0.044715, %v1223_v31  ;;  %v744_v33 = vpop.f32.mrb[5].mxu1  ;;  %v765_v13 = vmul.f32 0.5, %v1223_v31 }
 0x3ff   : > { %v767_v34 = vmul.f32 0.044715, %v744_v33  ;;  %v1224_v35 = vpop.f32.mrb[6].mxu1  ;;  %v763_v14 = vmul.f32 0.5, %v744_v33 }
 0x400   : > { %v773_v36 = vmul.f32 %v1223_v31, %v769_v32  ;;  %v770_v37 = vmul.f32 0.044715, %v1224_v35  ;;  %v747_v38 = vpop.f32.mrb[7].mxu1  ;;  %v766_v52 = vmul.f32 0.5, %v1224_v35 }
 0x401   : > { %v771_v39 = vmul.f32 %v767_v34, %v744_v33  ;;  %v768_v40 = vmul.f32 0.044715, %v747_v38  ;;  %v764_v54 = vmul.f32 0.5, %v747_v38 }
 0x402   : > { %v777_v41 = vmul.f32 %v1223_v31, %v773_v36  ;;  %v774_v42 = vmul.f32 %v1224_v35, %v770_v37 }
 0x403   : > { %v775_v43 = vmul.f32 %v771_v39, %v744_v33  ;;  %v772_v44 = vmul.f32 %v768_v40, %v747_v38 }
 0x404   : > { %v781_v45 = vadd.f32 %v1223_v31, %v777_v41  ;;  %v778_v4 = vmul.f32 %v1224_v35, %v774_v42 }
 0x405   : > { %v779_v5 = vadd.f32 %v775_v43, %v744_v33  ;;  %v776_v6 = vmul.f32 %v772_v44, %v747_v38 }
 0x406   : > { %v785_v7 = vmul.f32 0.7978846, %v781_v45  ;;  %v782_v8 = vadd.f32 %v1224_v35, %v778_v4 }
 0x407   : > { %v783_v10 = vmul.f32 0.7978846, %v779_v5  ;;  %v780_v11 = vadd.f32 %v776_v6, %v747_v38 }
 0x408   : > { %1332 = vtanh.f32 %v785_v7  ;;  %v786_v9 = vmul.f32 0.7978846, %v782_v8 }
 0x409   : > { %1334 = vtanh.f32 %v783_v10  ;;  %v784_v46 = vmul.f32 0.7978846, %v780_v11 }
 0x40a   : > { %1336 = vtanh.f32 %v786_v9 }
 0x40b   : > { %1338 = vtanh.f32 %v784_v46 }
 0x412   : > { %v1333_v47 = vpop.eup %1332 }
 0x413   : > { %v1335_v48 = vpop.eup %1334  ;;  %v793_v12 = vadd.f32 1.0, %v1333_v47 }
 0x414   : > { %v1337_v49 = vpop.eup %1336  ;;  %v791_v50 = vadd.f32 1.0, %v1335_v48 }
 0x415   : > { %v1339_v51 = vpop.eup %1338  ;;  %v794_v53 = vadd.f32 1.0, %v1337_v49  ;;  %v797_v56 = vmul.f32 %v793_v12, %v765_v13 }
 0x416   : > { %v792_v55 = vadd.f32 1.0, %v1339_v51  ;;  %v795_v58 = vmul.f32 %v791_v50, %v763_v14 }
 0x417   : > { %v798_v57 = vmul.f32 %v794_v53, %v766_v52 }
 0x418   : > { %v796_v59 = vmul.f32 %v792_v55, %v764_v54 }
 0x419   : > { %v804_v60 = vpack.c.bf16 %v798_v57, %v797_v56 }
 0x41a   : > { %v803_v61 = vpack.c.bf16 %v796_v59, %v795_v58 }
 0x41c   : > { %1225 = vmatprep.subr.bf16.mxu0 %v803_v61 }
 0x41d   : > { %1226 = vmatpush3.bf16.msra.mxu0 %v803_v61 }
 0x41e   : > { %1227 = vmatprep.subr.bf16.mxu0 %v804_v60 }
 0x421   : > { %1228 = vmatpush3.bf16.msra.mxu0 %v804_v60 }
 0x424   : > { %1230 = vmatmul.mubr.msk.bf16.vlgmr.msra.gmra.mrb[8].mxu0 %vm352_vm0, %v1307_v62 }
 0x4f7   : > { %v1231_v63 = vpop.f32.mrb[8].mxu0 }
 0x4f8   : > { %v876_v0 = vmul.f32 0.044715, %v1231_v63  ;;  %v855_v1 = vpop.f32.mrb[9].mxu0  ;;  %v872_v41 = vmul.f32 0.5, %v1231_v63 }
 0x4f9   : > { %v874_v2 = vmul.f32 0.044715, %v855_v1  ;;  %v1232_v3 = vpop.f32.mrb[10].mxu0  ;;  %v870_v38 = vmul.f32 0.5, %v855_v1 }
 0x4fa   : > { %v880_v15 = vmul.f32 %v1231_v63, %v876_v0  ;;  %v877_v16 = vmul.f32 0.044715, %v1232_v3  ;;  %v858_v17 = vpop.f32.mrb[11].mxu0  ;;  %v873_v5 = vmul.f32 0.5, %v1232_v3 }
 0x4fb   : > { %v878_v18 = vmul.f32 %v874_v2, %v855_v1  ;;  %v875_v19 = vmul.f32 0.044715, %v858_v17  ;;  %v871_v43 = vmul.f32 0.5, %v858_v17 }
 0x4fc   : > { %v884_v20 = vmul.f32 %v1231_v63, %v880_v15  ;;  %v881_v21 = vmul.f32 %v1232_v3, %v877_v16 }
 0x4fd   : > { %v882_v22 = vmul.f32 %v878_v18, %v855_v1  ;;  %v879_v23 = vmul.f32 %v875_v19, %v858_v17  ;;  %v951_v18 = vpop.permute.xlu0 %950  ;;  %v961_v19 = vpop.permute.xlu1 %960 }
 0x4fe   : > { %v888_v24 = vadd.f32 %v1231_v63, %v884_v20  ;;  %v885_v25 = vmul.f32 %v1232_v3, %v881_v21 }
 0x4ff   : > { %v886_v26 = vadd.f32 %v882_v22, %v855_v1  ;;  %v883_v27 = vmul.f32 %v879_v23, %v858_v17 }
 0x500   : > { %v892_v28 = vmul.f32 0.7978846, %v888_v24  ;;  %v889_v29 = vadd.f32 %v1232_v3, %v885_v25 }
 0x501   : > { %v890_v30 = vmul.f32 0.7978846, %v886_v26  ;;  %v887_v31 = vadd.f32 %v883_v27, %v858_v17  ;;  %v956_v25 = vpop.permute.xlu0 %955 }
 0x502   : > { %1340 = vtanh.f32 %v892_v28  ;;  %v893_v32 = vmul.f32 0.7978846, %v889_v29  ;;  %v966_v28 = vpop.permute.xlu1 %965 }
 0x503   : > { %1342 = vtanh.f32 %v890_v30  ;;  %v891_v33 = vmul.f32 0.7978846, %v887_v31 }
 0x504   : > { %1344 = vtanh.f32 %v893_v32 }
 0x505   : > { %1346 = vtanh.f32 %v891_v33  ;;  %v987_v33 = vlaneseq }
 0x50c   : > { %v1341_v34 = vpop.eup %1340 }
 0x50d   : > { %v1343_v35 = vpop.eup %1342  ;;  %v900_v37 = vadd.f32 1.0, %v1341_v34 }
 0x50e   : > { %v1345_v36 = vpop.eup %1344  ;;  %v898_v39 = vadd.f32 1.0, %v1343_v35 }
 0x50f   : > { %v1347_v40 = vpop.eup %1346  ;;  %v901_v42 = vadd.f32 1.0, %v1345_v36  ;;  %v904_v4 = vmul.f32 %v900_v37, %v872_v41  ;;  %v988_v36 = vshrl.u32 %v987_v33, 7  ;;  %v985_v41 = vpop.permute.xlu0 %984 }
 0x510   : > { %v899_v44 = vadd.f32 1.0, %v1347_v40  ;;  %v902_v45 = vmul.f32 %v898_v39, %v870_v38 }
 0x511   : > { %v905_v7 = vmul.f32 %v901_v42, %v873_v5  ;;  %v919_v9 = vmul.f32 %v904_v4, %v904_v4  ;;  %v989_v39 = vsub.s32 0, %v988_v36 }
 0x512   : > { %v903_v6 = vmul.f32 %v899_v44, %v871_v43  ;;  %v917_v11 = vmul.f32 %v902_v45, %v902_v45 }
 0x513   : > { %v920_v48 = vmul.f32 %v905_v7, %v905_v7  ;;  %v990_v43 = vrot.slane %v985_v41, %v989_v39 }
 0x514   : > { %v918_v8 = vmul.f32 %v903_v6, %v903_v6  ;;  %v906_v10 = vadd.f32 %v903_v6, %v902_v45 }
 0x516   : > { %v907_v46 = vadd.f32 %v906_v10, %v904_v4  ;;  %v921_v47 = vadd.f32 %v918_v8, %v917_v11 }
 0x518   : > { %v908_v12 = vadd.f32 %v907_v46, %v905_v7  ;;  %v922_v49 = vadd.f32 %v921_v47, %v919_v9 }
 0x51a   : > { %v909_v50 = vrot.slane %v908_v12, 4  ;;  %v923_v51 = vadd.f32 %v922_v49, %v920_v48 }
 0x51c   : > { %v910_v13 = vadd.f32 %v909_v50, %v908_v12  ;;  %v924_v52 = vrot.slane %v923_v51, 4 }
 0x51e   : > { %v911_v53 = vrot.slane %v910_v13, 2  ;;  %v925_v54 = vadd.f32 %v924_v52, %v923_v51 }
 0x520   : > { %v912_v14 = vadd.f32 %v911_v53, %v910_v13  ;;  %v926_v55 = vrot.slane %v925_v54, 2 }
 0x522   : > { %v913_v56 = vrot.slane %v912_v14, 1  ;;  %v927_v57 = vadd.f32 %v926_v55, %v925_v54 }
 0x524   : > { %v914_v58 = vadd.f32 %v913_v56, %v912_v14  ;;  %v928_v59 = vrot.slane %v927_v57, 1 }
 0x526   : > { %v916_v60 = vmul.f32 0.03125, %v914_v58  ;;  %v929_v61 = vadd.f32 %v928_v59, %v927_v57 }
 0x528   : > { %v930_v62 = vmul.f32 0.03125, %v929_v61  ;;  %v931_v63 = vmul.f32 %v916_v60, %v916_v60  ;;  %v934_v0 = vsub.f32 %v902_v45, %v916_v60  ;;  %v935_v1 = vsub.f32 %v903_v6, %v916_v60 }
 0x529   : > { %v936_v2 = vsub.f32 %v904_v4, %v916_v60  ;;  %v937_v3 = vsub.f32 %v905_v7, %v916_v60 }
 0x52a   : > { %v932_v15 = vsub.f32 %v930_v62, %v931_v63 }
 0x52c   : > { %v933_v16 = vmax.f32 %v932_v15, 0.0 }
 0x52e   : > { %v938_v17 = vadd.f32 1e-05, %v933_v16 }
 0x530   : > { %1348 = vrsqrt.f32 %v938_v17 }
 0x53a   : > { %v1349_v20 = vpop.eup %1348 }
 0x53b   : > { %v940_v21 = vmul.f32 %v1349_v20, %v934_v0  ;;  %v941_v22 = vmul.f32 %v1349_v20, %v935_v1  ;;  %v942_v23 = vmul.f32 %v1349_v20, %v936_v2  ;;  %v943_v24 = vmul.f32 %v1349_v20, %v937_v3 }
 0x53d   : > { %v968_v26 = vmul.f32 %v951_v18, %v940_v21  ;;  %v969_v27 = vmul.f32 %v956_v25, %v941_v22  ;;  %v970_v30 = vmul.f32 %v961_v19, %v942_v23  ;;  %v971_v32 = vmul.f32 %v966_v28, %v943_v24 }
 0x53f   : > { %v972_v29 = vadd.f32 %v969_v27, %v968_v26 }
 0x541   : > { %v973_v31 = vadd.f32 %v972_v29, %v970_v30 }
 0x543   : > { %v974_v34 = vadd.f32 %v973_v31, %v971_v32 }
 0x545   : > { %v975_v35 = vrot.slane %v974_v34, 4 }
 0x547   : > { %v976_v37 = vadd.f32 %v975_v35, %v974_v34 }
 0x549   : > { %v977_v38 = vrot.slane %v976_v37, 2 }
 0x54b   : > { %v978_v40 = vadd.f32 %v977_v38, %v976_v37 }
 0x54d   : > { %v979_v42 = vrot.slane %v978_v40, 1 }
 0x54f   : > { %v980_v44 = vadd.f32 %v979_v42, %v978_v40 }
 0x551   : > { %v991_v45 = vadd.f32 %v990_v43, %v980_v44 }
 0x553   : > { %992 = vst [vmem:[%s285_s22] sm:$0x1] %v991_v45 }
 0x554   : > { %1393 = shalt.err (!%p1390_p4)
}
 0x555   : > { %s1394_s27 = scalar_lea.hbm %s1723_s17, 16  ;;  %s1398_s9 = scalar_lea.hbm %s1773_s6, 32 }
 0x556   : > { %p1395_p5 = scmp.ne.s32.totalorder %s1723_s17, %s1394_s27  ;;  %p1399_p1 = scmp.lt.u32.totalorder %s1723_s17, %s1773_s6 }
 0x557   : > { %p1400_p3 = scmp.lt.u32.totalorder %s1398_s9, %s1394_s27  ;;  %p1402_p6 = scmp.lt.u32.totalorder %s1394_s27, %s1723_s17 }
 0x558   : > { %p1396_p7 = pnand %p1395_p5, %p1780_p12 }
 0x559   : > { %p1401_p11 = por %p1400_p3, %p1399_p1 }
 0x55a   : > { %p1397_p9 = pneg %p1396_p7 }
 0x55b   : > { %p1403_p13 = por %p1402_p6, %p1401_p11 }
 0x55d   : > { %p1404_p8 = pnand %p1403_p13, %p1397_p9 }
 0x55f   : > { %1407 = shalt.err (!%p1404_p8)
}
 0x560   : > { %1243 = dma.vmem_to_hbm [thread:$0]  (%p1780_p12), %s1725_s29, 16, %s1723_s17, %s994_s19  }
 0x561 PF: > { %s1018_s18 = sand.u32 1, %s1434_s23   ;;  %p1781_p10 = scmp.ne.s32.totalorder %s1778_s11, 0 }
 0x562   : > { %p1782_p0 = scmp.ge.s32.totalorder %s1446_s26, 2  ;;  %s1019_s22 = scalar_lea.sflag [#allocation5], %s1018_s18 }
 0x564   : > { %p1250_p2 = pnand %p1782_p0, %p1781_p10 }
 0x566   : > { %1429 = dma.done.wait (!%p1250_p2), %s1019_s22, 16  }
 0x567   : > { %1431 = vsyncadd (!%p1250_p2), %s1019_s22, 4294967280  ;;  %p21_p4 = scmp.ge.s32.totalorder %s1516_s28, 4   ;;  %s1783_s23 = smov %s1438_s24 }
 0x568   : > { %s1784_s24 = smov %s1442_s25  ;;  %s1785_s25 = smov %s1528_s7 }
 0x569   : > { %s1786_s26 = smov %s1516_s28  ;;  %23 = sbr.rel (!%p21_p4) target bundleno = 8 (0x8), region = 92 }
 0x570   :  { %1023 = vsyncpa [#allocation4], 1 }
 0x571   :  { %1025 = vsyncpa [#allocation4 + $0x1], 1 }
 0x572   :  { %1026 = vsyncpa [#allocation5], 1 }
 0x573   :  { %1028 = vsyncpa [#allocation5 + $0x1], 1 }

</bundles_post_ra>
